<compile_context>
chip_gen: v7x
topology: tpu7x:2x2x1
jax: 0.10.0
libtpu: 0.0.40
codegen_flags: <defaults>
</compile_context>

<pallas_src>
import functools

import jax
import jax.numpy as jnp
import numpy as np
from jax.experimental import pallas as pl
from jax.experimental.pallas import tpu as pltpu


def _round_up(n, m):
    return ((n + m - 1) // m) * m


def mlp_kernel(x_ref, w1_ref, b1_ref, w2_ref, b2_ref, o_ref, *, compute_dtype):
    # fc1: [TB, D] @ [D, Hp] -> f32 accumulate, bias + ReLU in f32 on the VPU.
    h = jnp.dot(x_ref[...], w1_ref[...], preferred_element_type=jnp.float32)
    h = jnp.maximum(h + b1_ref[...], 0.0)
    # fc2: [TB, Hp] @ [Hp, O] -> f32 accumulate; narrow (O=2) masked store is fine.
    o = jnp.dot(h.astype(compute_dtype), w2_ref[...],
                preferred_element_type=jnp.float32)
    o_ref[...] = (o + b2_ref[...]).astype(o_ref.dtype)


def mlp_regressor_forward(x, w1, b1, w2, b2, *,
                          compute_dtype=jnp.float32, block_b=512):
    """x: [B, D]; w1: [D, H]; b1: [1, H]; w2: [H, O]; b2: [1, O] -> [B, O] (f32)."""
    B, D = x.shape
    H = w1.shape[1]
    O = w2.shape[1]

    # --- Lane-align the hidden dim (400 -> 512). Zero padding is exact:
    # padded hidden units see zero weights + zero bias -> relu(0)=0 -> times
    # zero w2 rows -> contribute nothing.
    Hp = _round_up(H, 128)
    if Hp != H:
        w1 = jnp.pad(w1, ((0, 0), (0, Hp - H)))
        b1 = jnp.pad(b1, ((0, 0), (0, Hp - H)))
        w2 = jnp.pad(w2, ((0, Hp - H), (0, 0)))

    # --- Batch tiling: big tiles when B is large (pipelined DMA), otherwise a
    # single sublane-aligned tile. Pad the batch with zero rows and slice back.
    TB = block_b if B >= block_b else _round_up(max(B, 1), 8)
    Bp = _round_up(B, TB)
    if Bp != B:
        x = jnp.pad(x, ((0, Bp - B), (0, 0)))
    grid = (Bp // TB,)

    # Matmul operands in compute_dtype (bf16 on v6e/v7x is full MXU rate and
    # halves weight HBM traffic / VMEM residency); biases stay f32.
    x_c = x.astype(compute_dtype)
    w1_c = w1.astype(compute_dtype)
    w2_c = w2.astype(compute_dtype)
    b1_f = b1.astype(jnp.float32)
    b2_f = b2.astype(jnp.float32)

    # --- VMEM budget: resident weights/biases + 2x double-buffered x/out tiles
    # + f32 intermediate h tile, with margin. Never request v7x's full 64 MiB.
    itemsize = np.dtype(compute_dtype).itemsize
    vmem_bytes = (
        D * Hp * itemsize + Hp * O * itemsize + Hp * 4 + O * 4      # weights/biases
        + 2 * (TB * D * itemsize + TB * O * 4)                      # x/out double buffers
        + TB * Hp * 4                                               # h intermediate
    )
    vmem_limit = max(4 << 20, min(48 << 20, int(1.5 * vmem_bytes) + (2 << 20)))

    cost = pl.CostEstimate(
        flops=2 * Bp * D * Hp + 2 * Bp * Hp * O,
        transcendentals=0,
        bytes_accessed=(Bp * D * itemsize + D * Hp * itemsize
                        + Hp * O * itemsize + Hp * 4 + O * 4 + Bp * O * 4),
    )

    out = pl.pallas_call(
        functools.partial(mlp_kernel, compute_dtype=compute_dtype),
        out_shape=jax.ShapeDtypeStruct((Bp, O), jnp.float32),
        grid=grid,
        in_specs=[
            pl.BlockSpec((TB, D), lambda i: (i, 0)),   # streamed x tiles
            pl.BlockSpec((D, Hp), lambda i: (0, 0)),   # resident w1
            pl.BlockSpec((1, Hp), lambda i: (0, 0)),   # resident b1
            pl.BlockSpec((Hp, O), lambda i: (0, 0)),   # resident w2
            pl.BlockSpec((1, O), lambda i: (0, 0)),    # resident b2
        ],
        out_specs=pl.BlockSpec((TB, O), lambda i: (i, 0)),
        compiler_params=pltpu.CompilerParams(
            dimension_semantics=("parallel",),         # shard batch across v7x TCs
            vmem_limit_bytes=vmem_limit,
        ),
        cost_estimate=cost,
    )(x_c, w1_c, b1_f, w2_c, b2_f)

    return out[:B]


def init_params(key, input_dim, hidden=400, out=2):
    """Deterministic init mimicking torch.nn.Linear defaults:
    U(-1/sqrt(fan_in), 1/sqrt(fan_in)) for both weight and bias."""
    k1, k2, k3, k4 = jax.random.split(key, 4)
    bound1 = 1.0 / jnp.sqrt(jnp.float32(input_dim))
    bound2 = 1.0 / jnp.sqrt(jnp.float32(hidden))
    # Stored already transposed: [in_features, out_features]
    w1 = jax.random.uniform(k1, (input_dim, hidden), jnp.float32, -bound1, bound1)
    b1 = jax.random.uniform(k2, (1, hidden), jnp.float32, -bound1, bound1)
    w2 = jax.random.uniform(k3, (hidden, out), jnp.float32, -bound2, bound2)
    b2 = jax.random.uniform(k4, (1, out), jnp.float32, -bound2, bound2)
    return w1, b1, w2, b2


if __name__ == "__main__":
    key = jax.random.PRNGKey(0)
    batch, input_dim = 2, 32
    kx, kp = jax.random.split(key)
    x = jax.random.normal(kx, (batch, input_dim), jnp.float32)
    w1, b1, w2, b2 = init_params(kp, input_dim)

    # Reference in plain JAX (exact module semantics).
    ref = jnp.maximum(x @ w1 + b1, 0.0) @ w2 + b2

    # f32 path: exact semantics, tight tolerance.
    out = jax.block_until_ready(mlp_regressor_forward(x, w1, b1, w2, b2))
    assert out.shape == (batch, 2)
    assert jnp.allclose(out, ref, atol=1e-5, rtol=1e-5)

    # bf16 matmul path (v6e/v7x full-rate MXU): looser tolerance.
    out_bf16 = jax.block_until_ready(
        mlp_regressor_forward(x, w1, b1, w2, b2, compute_dtype=jnp.bfloat16))
    assert out_bf16.shape == (batch, 2)
    assert jnp.allclose(out_bf16, ref, atol=5e-2, rtol=5e-2)

    print("KERNEL_OK")
</pallas_src>

<mosaic_0001>
module attributes {stable_mosaic.version = 11 : i64} {
  func.func @mlp_kernel(%arg0: i32, %arg1: memref<8x32xf32, #tpu.memory_space<vmem>>, %arg2: memref<32x512xf32, #tpu.memory_space<vmem>>, %arg3: memref<1x512xf32, #tpu.memory_space<vmem>>, %arg4: memref<512x2xf32, #tpu.memory_space<vmem>>, %arg5: memref<1x2xf32, #tpu.memory_space<vmem>>, %arg6: memref<8x2xf32, #tpu.memory_space<vmem>>) attributes {dimension_semantics = [#tpu.dimension_semantics<parallel>], iteration_bounds = array<i64: 1>, scalar_prefetch = 0 : i64, scratch_operands = 0 : i64, tpu.core_type = #tpu.core_type<tc>, window_params = [{transform_indices = @transform_0, window_bounds = array<i64: 8, 32>}, {pipeline_mode = #tpu.pipeline_mode<synchronous>, transform_indices = @transform_1, window_bounds = array<i64: 32, 512>}, {pipeline_mode = #tpu.pipeline_mode<synchronous>, transform_indices = @transform_2, window_bounds = array<i64: 1, 512>}, {pipeline_mode = #tpu.pipeline_mode<synchronous>, transform_indices = @transform_3, window_bounds = array<i64: 512, 2>}, {pipeline_mode = #tpu.pipeline_mode<synchronous>, transform_indices = @transform_4, window_bounds = array<i64: 1, 2>}, {transform_indices = @transform_5, window_bounds = array<i64: 8, 2>}]} {
    %c0 = arith.constant 0 : index
    %c0_0 = arith.constant 0 : index
    %0 = vector.load %arg1[%c0, %c0_0] : memref<8x32xf32, #tpu.memory_space<vmem>>, vector<8x32xf32>
    %c0_1 = arith.constant 0 : index
    %c0_2 = arith.constant 0 : index
    %1 = vector.load %arg2[%c0_1, %c0_2] : memref<32x512xf32, #tpu.memory_space<vmem>>, vector<32x512xf32>
    %cst = arith.constant dense<0.000000e+00> : vector<8x512xf32>
    %2 = tpu.matmul %0, %1, %cst {dimension_numbers = #tpu.dot_dimension_numbers<[1], [0], [0], [1], [0, 0, 1, 1], [], []>} : vector<8x32xf32>, vector<32x512xf32>, vector<8x512xf32> -> vector<8x512xf32>
    %c0_3 = arith.constant 0 : index
    %c0_4 = arith.constant 0 : index
    %3 = vector.load %arg3[%c0_3, %c0_4] : memref<1x512xf32, #tpu.memory_space<vmem>>, vector<1x512xf32>
    %4 = vector.broadcast %3 : vector<1x512xf32> to vector<8x512xf32>
    %5 = arith.addf %2, %4 : vector<8x512xf32>
    %cst_5 = arith.constant 0.000000e+00 : f32
    %6 = vector.broadcast %cst_5 : f32 to vector<8x512xf32>
    %7 = arith.maximumf %5, %6 : vector<8x512xf32>
    %c0_6 = arith.constant 0 : index
    %c0_7 = arith.constant 0 : index
    %8 = vector.load %arg4[%c0_6, %c0_7] : memref<512x2xf32, #tpu.memory_space<vmem>>, vector<512x2xf32>
    %cst_8 = arith.constant dense<0.000000e+00> : vector<8x2xf32>
    %9 = tpu.matmul %7, %8, %cst_8 {dimension_numbers = #tpu.dot_dimension_numbers<[1], [0], [0], [1], [0, 0, 1, 1], [], []>} : vector<8x512xf32>, vector<512x2xf32>, vector<8x2xf32> -> vector<8x2xf32>
    %c0_9 = arith.constant 0 : index
    %c0_10 = arith.constant 0 : index
    %10 = vector.load %arg5[%c0_9, %c0_10] : memref<1x2xf32, #tpu.memory_space<vmem>>, vector<1x2xf32>
    %11 = vector.broadcast %10 : vector<1x2xf32> to vector<8x2xf32>
    %12 = arith.addf %9, %11 : vector<8x2xf32>
    %c0_11 = arith.constant 0 : index
    %c0_12 = arith.constant 0 : index
    %13 = vector.load %arg6[%c0_11, %c0_12] : memref<8x2xf32, #tpu.memory_space<vmem>>, vector<8x2xf32>
    tpu.vector_store %arg6[%c0_11, %c0_12], %12 {strides = array<i32>} : memref<8x2xf32, #tpu.memory_space<vmem>>, vector<8x2xf32>,
    return
  }
  func.func @transform_0(%arg0: i32) -> (i32, i32) {
    %c0_i32 = arith.constant 0 : i32
    %c0_i32_0 = arith.constant 0 : i32
    return %arg0, %c0_i32 : i32, i32
  }
  func.func @transform_1(%arg0: i32) -> (i32, i32) {
    %c0_i32 = arith.constant 0 : i32
    %c0_i32_0 = arith.constant 0 : i32
    %c0_i32_1 = arith.constant 0 : i32
    return %c0_i32, %c0_i32_0 : i32, i32
  }
  func.func @transform_2(%arg0: i32) -> (i32, i32) {
    %c0_i32 = arith.constant 0 : i32
    %c0_i32_0 = arith.constant 0 : i32
    %c0_i32_1 = arith.constant 0 : i32
    return %c0_i32, %c0_i32_0 : i32, i32
  }
  func.func @transform_3(%arg0: i32) -> (i32, i32) {
    %c0_i32 = arith.constant 0 : i32
    %c0_i32_0 = arith.constant 0 : i32
    %c0_i32_1 = arith.constant 0 : i32
    return %c0_i32, %c0_i32_0 : i32, i32
  }
  func.func @transform_4(%arg0: i32) -> (i32, i32) {
    %c0_i32 = arith.constant 0 : i32
    %c0_i32_0 = arith.constant 0 : i32
    %c0_i32_1 = arith.constant 0 : i32
    return %c0_i32, %c0_i32_0 : i32, i32
  }
  func.func @transform_5(%arg0: i32) -> (i32, i32) {
    %c0_i32 = arith.constant 0 : i32
    %c0_i32_0 = arith.constant 0 : i32
    return %arg0, %c0_i32 : i32, i32
  }
}

</mosaic_0001>

<bundles_post_ra>
// kernel: tpu_custom_call.1
= control target key start
LH: loop header
LB: loop body
LE: loop exit
PB: predicated region body
PF: predicated region fallthrough
CT: control target
= control target key end

     0   :  { %v580_v3 = vmov 0.0   ;;  %vm59_vm0 = vcmask 261120   ;;  %vm420_vm1 = vcmask 15360   ;;  %s865_s1 = inlined_call_operand.vmem [shape: f32[32,512], index: 1, kind: input, shape index: {}]   ;;  %s866_s3 = inlined_call_operand.vmem [shape: f32[512,2], index: 3, kind: input, shape index: {}]   ;;  %s867_s0 = inlined_call_operand.vmem [shape: f32[8,32], index: 0, kind: input, shape index: {}]   ;;  %s868_s2 = inlined_call_operand.vmem [shape: f32[1,512], index: 2, kind: input, shape index: {}]   ;;  %s869_s4 = inlined_call_operand.vmem [shape: f32[1,2], index: 4, kind: input, shape index: {}]   ;;  %s870_s5 = inlined_call_operand.vmem [shape: f32[8,2], index: 5, kind: output, shape index: {}]  }
   0x1   :  { %v22_v0 = vld [vmem:[%s865_s1 + $0x8] sm:$0xff]  ;;  %v24_v2 = vld [vmem:[%s865_s1 + $0x18] sm:$0xff]  ;;  %127 = vmatprep.mubr.f32.mxu0 %v580_v3  ;;  %198 = vmatprep.mubr.f32.mxu1 %v580_v3  ;;  %v21_v6 = vld [vmem:[%s865_s1] sm:$0xff] }
   0x2   :  { %v26_v1 = vld [vmem:[%s865_s1 + $0x28] sm:$0xff]  ;;  %v28_v5 = vld [vmem:[%s865_s1 + $0x38] sm:$0xff]  ;;  %v25_v7 = vld [vmem:[%s865_s1 + $0x20] sm:$0xff] }
   0x3   :  { %v499_v4 = vpack.c.bf16 %v26_v1, %v22_v0  ;;  %v507_v8 = vpack.c.bf16 %v28_v5, %v24_v2  ;;  %v501_v9 = vpack.c.bf16 %v25_v7, %v21_v6  ;;  %v23_v10 = vld [vmem:[%s865_s1 + $0x10] sm:$0xff]  ;;  %v30_v12 = vld [vmem:[%s865_s1 + $0x48] sm:$0xff]  ;;  %v32_v15 = vld [vmem:[%s865_s1 + $0x58] sm:$0xff] }
   0x4   :  { %v27_v11 = vld [vmem:[%s865_s1 + $0x30] sm:$0xff]  ;;  %v34_v14 = vld [vmem:[%s865_s1 + $0x68] sm:$0xff]  ;;  %v36_v16 = vld [vmem:[%s865_s1 + $0x78] sm:$0xff] }
   0x5   :  { %500 = vmatprep.subr.bf16.mxu0 %v499_v4  ;;  %v509_v13 = vpack.c.bf16 %v27_v11, %v23_v10  ;;  %508 = vmatprep.subr.bf16.mxu1 %v507_v8  ;;  %v503_v17 = vpack.c.bf16 %v34_v14, %v30_v12  ;;  %v511_v18 = vpack.c.bf16 %v36_v16, %v32_v15  ;;  %v29_v19 = vld [vmem:[%s865_s1 + $0x40] sm:$0xff]  ;;  %v31_v21 = vld [vmem:[%s865_s1 + $0x50] sm:$0xff]  ;;  %v226_v27 = vld [vmem:[%s866_s3 + $0x88] sm:$0xff] }
   0x6   :  { %502 = vmatpush1.bf16.msra.mxu0 %v501_v9  ;;  %v33_v20 = vld [vmem:[%s865_s1 + $0x60] sm:$0xff]  ;;  %v35_v23 = vld [vmem:[%s865_s1 + $0x70] sm:$0xff]  ;;  %v258_v29 = vld [vmem:[%s866_s3 + $0x188] sm:$0xff] }
   0x7   :  { %510 = vmatpush1.bf16.msra.mxu1 %v509_v13  ;;  %v505_v22 = vpack.c.bf16 %v33_v20, %v29_v19  ;;  %v225_v24 = vld [vmem:[%s866_s3 + $0x80] sm:$0xff]  ;;  %504 = vmatprep.subr.bf16.mxu0 %v503_v17  ;;  %v513_v25 = vpack.c.bf16 %v35_v23, %v31_v21  ;;  %v210_v33 = vld [vmem:[%s866_s3 + $0x8] sm:$0xff]  ;;  %v227_v37 = vld [vmem:[%s866_s3 + $0x90] sm:$0xff] }
   0x8   :  { %512 = vmatprep.subr.bf16.mxu1 %v511_v18  ;;  %v20_v26 = vld [vmem:[%s867_s0] sm:$0xff]  ;;  %v515_v30 = vpack.c.bf16 %v226_v27, %v225_v24  ;;  %v242_v36 = vld [vmem:[%s866_s3 + $0x108] sm:$0xff]  ;;  %v228_v38 = vld [vmem:[%s866_s3 + $0x98] sm:$0xff] }
   0x9   :  { %v257_v28 = vld [vmem:[%s866_s3 + $0x180] sm:$0xff]  ;;  %v519_v40 = vpack.c.bf16 %v228_v38, %v227_v37  ;;  %v259_v41 = vld [vmem:[%s866_s3 + $0x190] sm:$0xff]  ;;  %v260_v42 = vld [vmem:[%s866_s3 + $0x198] sm:$0xff] }
   0xa   :  { %v547_v31 = vpack.c.bf16 %v258_v29, %v257_v28  ;;  %v209_v32 = vld [vmem:[%s866_s3] sm:$0xff]  ;;  %506 = vmatpush1.bf16.msra.mxu0 %v505_v22  ;;  %v211_v43 = vld [vmem:[%s866_s3 + $0x10] sm:$0xff]  ;;  %v551_v44 = vpack.c.bf16 %v260_v42, %v259_v41  ;;  %v212_v45 = vld [vmem:[%s866_s3 + $0x18] sm:$0xff] }
   0xb   :  { %v241_v34 = vld [vmem:[%s866_s3 + $0x100] sm:$0xff]  ;;  %v517_v35 = vpack.c.bf16 %v210_v33, %v209_v32  ;;  %514 = vmatpush1.bf16.msra.mxu1 %v513_v25  ;;  %516 = vmatprep.subr.bf16.mxu0 %v515_v30  ;;  %v243_v46 = vld [vmem:[%s866_s3 + $0x110] sm:$0xff]  ;;  %v244_v47 = vld [vmem:[%s866_s3 + $0x118] sm:$0xff]  ;;  %v521_v51 = vpack.c.bf16 %v212_v45, %v211_v43 }
   0xc   :  { %v549_v39 = vpack.c.bf16 %v242_v36, %v241_v34  ;;  %548 = vmatprep.subr.bf16.mxu1 %v547_v31  ;;  %v229_v48 = vld [vmem:[%s866_s3 + $0xa0] sm:$0xff]  ;;  %v230_v49 = vld [vmem:[%s866_s3 + $0xa8] sm:$0xff]  ;;  %v553_v53 = vpack.c.bf16 %v244_v47, %v243_v46  ;;  %v231_v60 = vld [vmem:[%s866_s3 + $0xb0] sm:$0xff] }
   0xd   :  { %426 = vmatmul.mubr.msk.f32.vlgmr.msra.gmra.mrb[0].mxu0 %vm59_vm0, %v20_v26  ;;  %v261_v50 = vld [vmem:[%s866_s3 + $0x1a0] sm:$0xff]  ;;  %v262_v52 = vld [vmem:[%s866_s3 + $0x1a8] sm:$0xff]  ;;  %v523_v54 = vpack.c.bf16 %v230_v49, %v229_v48  ;;  %v232_v61 = vld [vmem:[%s866_s3 + $0xb8] sm:$0xff] }
   0xe   :  { %427 = vmatmul.mubr.msk.f32.vlgmr.msra.gmra.mrb[0].mxu1 %vm59_vm0, %v20_v26  ;;  %518 = vmatpush3.bf16.msra.mxu0 %v517_v35  ;;  %v213_v55 = vld [vmem:[%s866_s3 + $0x20] sm:$0xff]  ;;  %v214_v56 = vld [vmem:[%s866_s3 + $0x28] sm:$0xff]  ;;  %v555_v58 = vpack.c.bf16 %v262_v52, %v261_v50  ;;  %v263_v62 = vld [vmem:[%s866_s3 + $0x1b0] sm:$0xff]  ;;  %v527_v2 = vpack.c.bf16 %v232_v61, %v231_v60 }
   0xf   :  { %550 = vmatpush3.bf16.msra.mxu1 %v549_v39  ;;  %520 = vmatprep.subr.bf16.mxu0 %v519_v40  ;;  %v245_v57 = vld [vmem:[%s866_s3 + $0x120] sm:$0xff]  ;;  %v246_v59 = vld [vmem:[%s866_s3 + $0x128] sm:$0xff]  ;;  %v264_v63 = vld [vmem:[%s866_s3 + $0x1b8] sm:$0xff]  ;;  %v525_v0 = vpack.c.bf16 %v214_v56, %v213_v55 }
  0x10   :  { %552 = vmatprep.subr.bf16.mxu1 %v551_v44  ;;  %v557_v1 = vpack.c.bf16 %v246_v59, %v245_v57  ;;  %v215_v3 = vld [vmem:[%s866_s3 + $0x30] sm:$0xff]  ;;  %v216_v4 = vld [vmem:[%s866_s3 + $0x38] sm:$0xff]  ;;  %v559_v6 = vpack.c.bf16 %v264_v63, %v263_v62  ;;  %v233_v8 = vld [vmem:[%s866_s3 + $0xc0] sm:$0xff] }
  0x11   :  { %v247_v5 = vld [vmem:[%s866_s3 + $0x130] sm:$0xff]  ;;  %v248_v7 = vld [vmem:[%s866_s3 + $0x138] sm:$0xff]  ;;  %v234_v9 = vld [vmem:[%s866_s3 + $0xc8] sm:$0xff]  ;;  %v529_v12 = vpack.c.bf16 %v216_v4, %v215_v3 }
  0x12   :  { %522 = vmatpush3.bf16.msra.mxu0 %v521_v51  ;;  %v265_v10 = vld [vmem:[%s866_s3 + $0x1c0] sm:$0xff]  ;;  %v266_v11 = vld [vmem:[%s866_s3 + $0x1c8] sm:$0xff]  ;;  %v561_v13 = vpack.c.bf16 %v248_v7, %v247_v5  ;;  %v531_v14 = vpack.c.bf16 %v234_v9, %v233_v8  ;;  %v235_v20 = vld [vmem:[%s866_s3 + $0xd0] sm:$0xff] }
  0x13   :  { %554 = vmatpush3.bf16.msra.mxu1 %v553_v53  ;;  %524 = vmatprep.subr.bf16.mxu0 %v523_v54  ;;  %v217_v15 = vld [vmem:[%s866_s3 + $0x40] sm:$0xff]  ;;  %v218_v16 = vld [vmem:[%s866_s3 + $0x48] sm:$0xff]  ;;  %v563_v18 = vpack.c.bf16 %v266_v11, %v265_v10  ;;  %v236_v21 = vld [vmem:[%s866_s3 + $0xd8] sm:$0xff] }
  0x14   :  { %556 = vmatprep.subr.bf16.mxu1 %v555_v58  ;;  %v249_v17 = vld [vmem:[%s866_s3 + $0x140] sm:$0xff]  ;;  %v250_v19 = vld [vmem:[%s866_s3 + $0x148] sm:$0xff]  ;;  %v267_v22 = vld [vmem:[%s866_s3 + $0x1d0] sm:$0xff]  ;;  %v533_v24 = vpack.c.bf16 %v218_v16, %v217_v15  ;;  %v535_v26 = vpack.c.bf16 %v236_v21, %v235_v20  ;;  %v39_v58 = vlaneseq }
  0x15   :  { %v268_v23 = vld [vmem:[%s866_s3 + $0x1d8] sm:$0xff]  ;;  %v565_v25 = vpack.c.bf16 %v250_v19, %v249_v17  ;;  %v219_v27 = vld [vmem:[%s866_s3 + $0x50] sm:$0xff]  ;;  %v237_v32 = vld [vmem:[%s866_s3 + $0xe0] sm:$0xff] }
  0x16   :  { %526 = vmatpush3.bf16.msra.mxu0 %v525_v0  ;;  %v220_v28 = vld [vmem:[%s866_s3 + $0x58] sm:$0xff]  ;;  %v251_v29 = vld [vmem:[%s866_s3 + $0x150] sm:$0xff]  ;;  %v567_v30 = vpack.c.bf16 %v268_v23, %v267_v22  ;;  %v238_v33 = vld [vmem:[%s866_s3 + $0xe8] sm:$0xff]  ;;  %v40_v59 = vshrl.u32 %v39_v58, 7 }
  0x17   :  { %558 = vmatpush3.bf16.msra.mxu1 %v557_v1  ;;  %528 = vmatprep.subr.bf16.mxu0 %v527_v2  ;;  %v252_v31 = vld [vmem:[%s866_s3 + $0x158] sm:$0xff]  ;;  %v269_v34 = vld [vmem:[%s866_s3 + $0x1e0] sm:$0xff]  ;;  %v270_v35 = vld [vmem:[%s866_s3 + $0x1e8] sm:$0xff]  ;;  %v537_v36 = vpack.c.bf16 %v220_v28, %v219_v27  ;;  %v539_v38 = vpack.c.bf16 %v238_v33, %v237_v32 }
  0x18   :  { %560 = vmatprep.subr.bf16.mxu1 %v559_v6  ;;  %v569_v37 = vpack.c.bf16 %v252_v31, %v251_v29  ;;  %v571_v39 = vpack.c.bf16 %v270_v35, %v269_v34  ;;  %v221_v40 = vld [vmem:[%s866_s3 + $0x60] sm:$0xff]  ;;  %v222_v41 = vld [vmem:[%s866_s3 + $0x68] sm:$0xff]  ;;  %v239_v46 = vld [vmem:[%s866_s3 + $0xf0] sm:$0xff]  ;;  %v41_v60 = vsub.s32 0, %v40_v59  ;;  %v49_v62 = vsub.s32 2, %v40_v59 }
  0x19   :  { %v253_v42 = vld [vmem:[%s866_s3 + $0x160] sm:$0xff]  ;;  %v541_v43 = vpack.c.bf16 %v222_v41, %v221_v40  ;;  %v254_v44 = vld [vmem:[%s866_s3 + $0x168] sm:$0xff]  ;;  %v240_v47 = vld [vmem:[%s866_s3 + $0xf8] sm:$0xff]  ;;  %v45_v63 = vsub.s32 1, %v40_v59  ;;  %v53_v0 = vsub.s32 3, %v40_v59 }
  0x1a   :  { %530 = vmatpush3.bf16.msra.mxu0 %v529_v12  ;;  %v573_v45 = vpack.c.bf16 %v254_v44, %v253_v42  ;;  %v271_v48 = vld [vmem:[%s866_s3 + $0x1f0] sm:$0xff]  ;;  %v543_v49 = vpack.c.bf16 %v240_v47, %v239_v46  ;;  %v272_v50 = vld [vmem:[%s866_s3 + $0x1f8] sm:$0xff]  ;;  %v37_v61 = vld [vmem:[%s868_s2] sm:$0xf] }
  0x1b   :  { %562 = vmatpush3.bf16.msra.mxu1 %v561_v13  ;;  %532 = vmatprep.subr.bf16.mxu0 %v531_v14  ;;  %v223_v51 = vld [vmem:[%s866_s3 + $0x70] sm:$0xff]  ;;  %v224_v52 = vld [vmem:[%s866_s3 + $0x78] sm:$0xff]  ;;  %v575_v53 = vpack.c.bf16 %v272_v50, %v271_v48  ;;  %v42_v1 = vrot.slane %v37_v61, %v41_v60  ;;  %v50_v2 = vrot.slane %v37_v61, %v49_v62  ;;  %v428_v19 = vld [vmem:[%s869_s4] ss:$0 sm:$0xff] }
  0x1c   :  { %564 = vmatprep.subr.bf16.mxu1 %v563_v18  ;;  %v545_v54 = vpack.c.bf16 %v224_v52, %v223_v51  ;;  %v255_v55 = vld [vmem:[%s866_s3 + $0x170] sm:$0xff]  ;;  %v256_v56 = vld [vmem:[%s866_s3 + $0x178] sm:$0xff]  ;;  %v46_v3 = vrot.slane %v37_v61, %v45_v63  ;;  %v54_v4 = vrot.slane %v37_v61, %v53_v0 }
  0x1d   :  { %v577_v57 = vpack.c.bf16 %v256_v56, %v255_v55 }
  0x1e   :  { %534 = vmatpush3.bf16.msra.mxu0 %v533_v24 }
  0x1f   :  { %566 = vmatpush3.bf16.msra.mxu1 %v565_v25  ;;  %536 = vmatprep.subr.bf16.mxu0 %v535_v26 }
  0x20   :  { %568 = vmatprep.subr.bf16.mxu1 %v567_v30 }
  0x22   :  { %538 = vmatpush3.bf16.msra.mxu0 %v537_v36 }
  0x23   :  { %570 = vmatpush3.bf16.msra.mxu1 %v569_v37  ;;  %540 = vmatprep.subr.bf16.mxu0 %v539_v38 }
  0x24   :  { %572 = vmatprep.subr.bf16.mxu1 %v571_v39 }
  0x26   :  { %542 = vmatpush3.bf16.msra.mxu0 %v541_v43 }
  0x27   :  { %574 = vmatpush3.bf16.msra.mxu1 %v573_v45  ;;  %544 = vmatprep.subr.bf16.mxu0 %v543_v49 }
  0x28   :  { %576 = vmatprep.subr.bf16.mxu1 %v575_v53 }
  0x2a   :  { %546 = vmatpush3.bf16.msra.mxu0 %v545_v54 }
  0x2b   :  { %578 = vmatpush3.bf16.msra.mxu1 %v577_v57 }
  0xe0   :  { %v129_v5 = vpop.f32.mrb[0].mxu0 }
  0xe1   :  { %v130_v6 = vadd.f32 %v129_v5, %v42_v1  ;;  %v200_v7 = vpop.f32.mrb[0].mxu1  ;;  %v131_v8 = vpop.f32.mrb[1].mxu0 }
  0xe2   :  { %v201_v9 = vadd.f32 %v200_v7, %v50_v2  ;;  %v132_v10 = vadd.f32 %v131_v8, %v46_v3  ;;  %v202_v11 = vpop.f32.mrb[1].mxu1 }
  0xe3   :  { %v203_v12 = vadd.f32 %v202_v11, %v54_v4  ;;  %v205_v15 = vmax.f32 %v130_v6, 0.0 }
  0xe4   :  { %v207_v13 = vmax.f32 %v201_v9, 0.0  ;;  %v206_v14 = vmax.f32 %v132_v10, 0.0 }
  0xe5   :  { %v208_v16 = vmax.f32 %v203_v12, 0.0 }
  0xe6   :  { %344 = vmatprep.mubr.f32.mxu0 %v206_v14 }
  0xe7   :  { %414 = vmatprep.mubr.f32.mxu1 %v208_v16  ;;  %345 = vmatmul.mubr.f32.vlgmr.msra.gmra.mrb[2].mxu0 %v205_v15 }
  0xe8   :  { %415 = vmatmul.mubr.f32.vlgmr.msra.gmra.mrb[2].mxu1 %v207_v13 }
 0x1ba   :  { %v461_v17 = vpop.f32.mrb[2].mxu0 }
 0x1bb   :  { %v496_v18 = vpop.f32.mrb[2].mxu1  ;;  %v462_v20 = vpop.f32.mrb[3].mxu0 }
 0x1bc   :  { %v463_v21 = vadd.f32 %v462_v20, %v461_v17  ;;  %v497_v22 = vpop.f32.mrb[3].mxu1 }
 0x1bd   :  { %v498_v23 = vadd.f32 %v497_v22, %v496_v18 }
 0x1be   :  { %v347_v24 = vadd.f32 %v463_v21, %v428_v19 }
 0x1c0   :  { %v417_v25 = vadd.f32 %v498_v23, %v347_v24 }
 0x1c2   :  { %421 = vst.msk [vmem:[%s870_s5] sm:$0xff] %vm420_vm1, %v417_v25 }

</bundles_post_ra>
